<compile_context>
chip_gen: v5e
topology: v5e:2x2
jax: 0.10.0
libtpu: 0.0.40
codegen_flags: <defaults>
</compile_context>

<pallas_src>
import jax
import jax.numpy as jnp
from jax.experimental import pallas as pl
from jax.experimental.pallas import tpu as pltpu


def _round_up(a, b):
    return (a + b - 1) // b * b


def _patch_embed_kernel(x_ref, w_ref, b_ref, o_ref):
    # x_ref: (TM, K)    bf16 flattened patches (one M tile)
    # w_ref: (K, E_pad) bf16 projection weight (VMEM-resident)
    # b_ref: (1, E_pad) f32 bias               (VMEM-resident)
    # o_ref: (TM, E_pad)
    acc = jnp.dot(x_ref[...], w_ref[...], preferred_element_type=jnp.float32)
    o_ref[...] = (acc + b_ref[...]).astype(o_ref.dtype)


def patch_embed(x, weight, bias, patch_size, *, compute_dtype=jnp.bfloat16):
    """x: (B, C, H, W) NCHW.  weight: (E, C, ph, pw) as in nn.Conv2d.  bias: (E,).
       Returns (B, num_patches, E) matching PyTorch PatchEmbed.forward."""
    B, C, H, W = x.shape
    ph, pw = patch_size
    E = weight.shape[0]
    gh, gw = H // ph, W // pw
    N = gh * gw
    M = B * N
    K = C * ph * pw
    out_dtype = x.dtype

    # --- im2col glue: same element order as Conv2d's implicit unfold ----------
    # (B, C, gh, ph, gw, pw) -> (B, gh, gw, C, ph, pw) -> (B*N, K)
    xp = x.reshape(B, C, gh, ph, gw, pw)
    xp = jnp.transpose(xp, (0, 2, 4, 1, 3, 5)).reshape(M, K)
    # TODO(synk): if XLA declines to fuse this transpose into the Pallas input
    # DMA (allow_input_fusion below), the full fix is a manual-DMA gather kernel
    # over the raw NCHW tensor (memory_space=pl.ANY + make_async_copy).

    # conv weight (E, C, ph, pw) -> (K, E); bias -> (1, E) kept in f32
    w2d = weight.reshape(E, K).T
    b2d = bias.reshape(1, E).astype(jnp.float32)

    # --- lane-dense output: pad embed dim to a multiple of 128 ----------------
    E_pad = _round_up(E, 128)
    if E_pad != E:
        w2d = jnp.pad(w2d, ((0, 0), (0, E_pad - E)))
        b2d = jnp.pad(b2d, ((0, 0), (0, E_pad - E)))

    # --- bf16 MXU operands (f32 accumulation happens inside the kernel) -------
    xp = xp.astype(compute_dtype)
    w2d = w2d.astype(compute_dtype)
    x_bytes = jnp.dtype(compute_dtype).itemsize
    o_bytes = jnp.dtype(out_dtype).itemsize

    # --- M tiling: large enough to amortize per-step overhead, small enough to
    #     keep the double-buffered pipeline inside v7x's 64 MiB VMEM. ----------
    TM = min(512, _round_up(M, 8))
    while TM > 8 and 2 * TM * (K * x_bytes + E_pad * o_bytes) > (24 << 20):
        TM = max(8, TM // 2)
    M_pad = _round_up(M, TM)
    if M_pad != M:
        xp = jnp.pad(xp, ((0, M_pad - M), (0, 0)))
    grid_m = M_pad // TM
    # NOTE: K = C*ph*pw stays small for patch embedding (<~1.5K); if it ever got
    # huge, add a K grid axis ("arbitrary") with a VMEM f32 accumulator scratch.

    # --- explicit VMEM budget: 2x double-buffered x/out tiles + resident W/b --
    vmem_bytes = (2 * TM * K * x_bytes + 2 * TM * E_pad * o_bytes
                  + 2 * K * E_pad * x_bytes + 2 * E_pad * 4 + (4 << 20))
    vmem_bytes = int(min(max(vmem_bytes, 16 << 20), 48 << 20))

    cost = pl.CostEstimate(
        flops=2 * M_pad * K * E_pad,
        transcendentals=0,
        bytes_accessed=(M_pad * K * x_bytes + K * E_pad * x_bytes
                        + E_pad * 4 + M_pad * E_pad * o_bytes),
    )

    out = pl.pallas_call(
        _patch_embed_kernel,
        out_shape=jax.ShapeDtypeStruct((M_pad, E_pad), out_dtype),
        grid_spec=pltpu.PrefetchScalarGridSpec(
            num_scalar_prefetch=0,
            grid=(grid_m,),
            in_specs=[
                pl.BlockSpec((TM, K), lambda i: (i, 0)),       # patches: tiled over M
                pl.BlockSpec((K, E_pad), lambda i: (0, 0)),    # weight: fetched once
                pl.BlockSpec((1, E_pad), lambda i: (0, 0)),    # bias:   fetched once
            ],
            out_specs=pl.BlockSpec((TM, E_pad), lambda i: (i, 0)),
        ),
        compiler_params=pltpu.CompilerParams(
            dimension_semantics=("parallel",),          # megacore split on v7x
            vmem_limit_bytes=vmem_bytes,
            allow_input_fusion=[True, False, False],    # fuse im2col into input DMA
        ),
        cost_estimate=cost,
    )(xp, w2d, b2d)

    return out[:M, :E].reshape(B, N, E)


if __name__ == "__main__":
    # Small config consistent with the module:
    #   img_size = (16, 16), patch_size = (8, 8), in_chans = 4, embed_dim = 32
    #   -> num_patches = 4, K = 4*8*8 = 256
    B, C, H, W = 2, 4, 16, 16
    ph, pw = 8, 8
    E = 32

    key = jax.random.PRNGKey(0)
    kx, kw, kb = jax.random.split(key, 3)

    x = jax.random.normal(kx, (B, C, H, W), dtype=jnp.float32)

    # Deterministic synthetic Conv2d parameters (shapes from nn.Conv2d(C, E, 8, 8)).
    fan_in = C * ph * pw
    bound = 1.0 / (fan_in ** 0.5)
    weight = jax.random.uniform(kw, (E, C, ph, pw), jnp.float32, -bound, bound)
    bias = jax.random.uniform(kb, (E,), jnp.float32, -bound, bound)

    out = patch_embed(x, weight, bias, (ph, pw))
    out = jax.block_until_ready(out)

    # Reference: plain XLA conv (f32).
    ref = jax.lax.conv_general_dilated(
        x, weight, window_strides=(ph, pw), padding="VALID",
        dimension_numbers=("NCHW", "OIHW", "NCHW"))
    ref = ref + bias.reshape(1, E, 1, 1)
    ref = ref.reshape(B, E, -1).transpose(0, 2, 1)

    assert out.shape == (B, (H // ph) * (W // pw), E)
    # bf16 MXU operands with f32 accumulation -> loosened tolerance vs f32 ref.
    assert jnp.allclose(out, ref, atol=5e-2, rtol=5e-2)

    print("KERNEL_OK")
</pallas_src>

<mosaic_0001>
module attributes {stable_mosaic.version = 11 : i64} {
  func.func @_patch_embed_kernel(%arg0: i32, %arg1: memref<8x256xbf16, #tpu.memory_space<vmem>>, %arg2: memref<256x128xbf16, #tpu.memory_space<vmem>>, %arg3: memref<1x128xf32, #tpu.memory_space<vmem>>, %arg4: memref<8x128xf32, #tpu.memory_space<vmem>>) attributes {dimension_semantics = [#tpu.dimension_semantics<parallel>], iteration_bounds = array<i64: 1>, scalar_prefetch = 0 : i64, scratch_operands = 0 : i64, tpu.core_type = #tpu.core_type<tc>, window_params = [{transform_indices = @transform_0, window_bounds = array<i64: 8, 256>}, {pipeline_mode = #tpu.pipeline_mode<synchronous>, transform_indices = @transform_1, window_bounds = array<i64: 256, 128>}, {pipeline_mode = #tpu.pipeline_mode<synchronous>, transform_indices = @transform_2, window_bounds = array<i64: 1, 128>}, {transform_indices = @transform_3, window_bounds = array<i64: 8, 128>}]} {
    %c0 = arith.constant 0 : index
    %c0_0 = arith.constant 0 : index
    %0 = vector.load %arg1[%c0, %c0_0] : memref<8x256xbf16, #tpu.memory_space<vmem>>, vector<8x256xbf16>
    %c0_1 = arith.constant 0 : index
    %c0_2 = arith.constant 0 : index
    %1 = vector.load %arg2[%c0_1, %c0_2] : memref<256x128xbf16, #tpu.memory_space<vmem>>, vector<256x128xbf16>
    %cst = arith.constant dense<0.000000e+00> : vector<8x128xf32>
    %2 = tpu.matmul %0, %1, %cst {dimension_numbers = #tpu.dot_dimension_numbers<[1], [0], [0], [1], [0, 0, 1, 1], [], []>} : vector<8x256xbf16>, vector<256x128xbf16>, vector<8x128xf32> -> vector<8x128xf32>
    %c0_3 = arith.constant 0 : index
    %c0_4 = arith.constant 0 : index
    %3 = vector.load %arg3[%c0_3, %c0_4] : memref<1x128xf32, #tpu.memory_space<vmem>>, vector<1x128xf32>
    %4 = vector.broadcast %3 : vector<1x128xf32> to vector<8x128xf32>
    %5 = arith.addf %2, %4 : vector<8x128xf32>
    %c0_5 = arith.constant 0 : index
    %c0_6 = arith.constant 0 : index
    %6 = vector.load %arg4[%c0_5, %c0_6] : memref<8x128xf32, #tpu.memory_space<vmem>>, vector<8x128xf32>
    tpu.vector_store %arg4[%c0_5, %c0_6], %5 {strides = array<i32>} : memref<8x128xf32, #tpu.memory_space<vmem>>, vector<8x128xf32>,
    return
  }
  func.func @transform_0(%arg0: i32) -> (i32, i32) {
    %c0_i32 = arith.constant 0 : i32
    %c0_i32_0 = arith.constant 0 : i32
    return %arg0, %c0_i32 : i32, i32
  }
  func.func @transform_1(%arg0: i32) -> (i32, i32) {
    %c0_i32 = arith.constant 0 : i32
    %c0_i32_0 = arith.constant 0 : i32
    %c0_i32_1 = arith.constant 0 : i32
    return %c0_i32, %c0_i32_0 : i32, i32
  }
  func.func @transform_2(%arg0: i32) -> (i32, i32) {
    %c0_i32 = arith.constant 0 : i32
    %c0_i32_0 = arith.constant 0 : i32
    %c0_i32_1 = arith.constant 0 : i32
    return %c0_i32, %c0_i32_0 : i32, i32
  }
  func.func @transform_3(%arg0: i32) -> (i32, i32) {
    %c0_i32 = arith.constant 0 : i32
    %c0_i32_0 = arith.constant 0 : i32
    return %arg0, %c0_i32 : i32, i32
  }
}

</mosaic_0001>

<bundles_post_ra>
// kernel: tpu_custom_call.1
= control target key start
LH: loop header
LB: loop body
LE: loop exit
PB: predicated region body
PF: predicated region fallthrough
CT: control target
= control target key end

     0   :  { %8 = vsyncpa [#allocation3], 0  ;;  %s431_s0 = inlined_call_operand.hbm [shape: bf16[8,256], index: 0, kind: input, shape index: {}]   ;;  %s432_s1 = inlined_call_operand.hbm [shape: bf16[256,128], index: 1, kind: input, shape index: {}]   ;;  %s433_s2 = inlined_call_operand.vmem [shape: f32[1,128], index: 2, kind: input, shape index: {}]   ;;  %s434_s3 = inlined_call_operand.hbm [shape: f32[8,128], index: 3, kind: output, shape index: {}]  }
   0x1   :  { %9 = vsyncpa [#allocation6], 0 }
   0x2   :  { %10 = vsyncpa [#allocation4], 0  ;;  %s16_s14 = sshll.u32 %s431_s0, 4  ;;  %s394_s15 = smov [#allocation2]   ;;  %s17_s14 = int_to_ptr.hbm [resolvable:$true] %s16_s14 }
   0x3   :  { %s18_s16 = sshll.u32 %s394_s15, 4  ;;  %s26_s19 = sshll.u32 %s432_s1, 4  ;;  %s19_s16 = int_to_ptr.vmem [resolvable:$true] %s18_s16  ;;  %s27_s19 = int_to_ptr.hbm [resolvable:$true] %s26_s19 }
   0x4   :  { %21 = dma.hbm_to_vmem [thread:$0]  %s17_s14, 128, %s19_s16, [#allocation3]  }
   0x5   :  { %s395_s20 = smov [#allocation5]   ;;  %s396_s22 = smov 64  }
   0x6   :  { %s28_s21 = sshll.u32 %s395_s20, 4  ;;  %s397_s23 = smov 4   ;;  %s29_s21 = int_to_ptr.vmem [resolvable:$true] %s28_s21 }
   0x7   :  { %34 = dma.hbm_to_vmem [thread:$0]  %s27_s19, 2048, %s29_s21, [#allocation6], %s396_s22, %s396_s22, %s397_s23  }
   0x8   :  { %388 = dma.done.wait [#allocation3], 128  }
   0x9   :  { %389 = vsyncadd [#allocation3], 4294967168 }
   0xa   :  { %390 = dma.done.wait [#allocation6], 2048  }
   0xb   :  { %391 = vsyncadd [#allocation6], 4294965248  ;;  %v301_v0 = vld [vmem:[#allocation5 + $0x38] sm:$0xff]  ;;  %v300_v2 = vld [vmem:[#allocation5 + $0x30] sm:$0xff]  ;;  %s398_s24 = smov [#allocation7]   ;;  %s219_s28 = sshll.u32 %s434_s3, 4  ;;  %s220_s28 = int_to_ptr.hbm [resolvable:$true] %s219_s28 }
   0xc   :  { %v309_v1 = vld [vmem:[#allocation5 + $0x78] sm:$0xff]  ;;  %185 = vmatpush.bf16.msra.mxu0 %v301_v0  ;;  %v308_v3 = vld [vmem:[#allocation5 + $0x70] sm:$0xff]  ;;  %v299_v4 = vld [vmem:[#allocation5 + $0x28] sm:$0xff]  ;;  %s217_s25 = sshll.u32 %s398_s24, 4  ;;  %s218_s25 = int_to_ptr.vmem [resolvable:$true] %s217_s25 }
   0xd   :  { %198 = vmatpush.bf16.msra.mxu1 %v309_v1  ;;  %v307_v5 = vld [vmem:[#allocation5 + $0x68] sm:$0xff]  ;;  %v298_v6 = vld [vmem:[#allocation5 + $0x20] sm:$0xff]  ;;  %v297_v8 = vld [vmem:[#allocation5 + $0x18] sm:$0xff] }
   0xe   :  { %v306_v7 = vld [vmem:[#allocation5 + $0x60] sm:$0xff]  ;;  %v305_v9 = vld [vmem:[#allocation5 + $0x58] sm:$0xff]  ;;  %v296_v10 = vld [vmem:[#allocation5 + $0x10] sm:$0xff] }
   0xf   :  { %v304_v11 = vld [vmem:[#allocation5 + $0x50] sm:$0xff]  ;;  %v295_v12 = vld [vmem:[#allocation5 + $0x8] sm:$0xff]  ;;  %v45_v14 = vld [vmem:[#allocation2] sm:$0xff] }
  0x10   :  { %186 = vmatpush.bf16.msra.mxu0 %v300_v2  ;;  %v303_v13 = vld [vmem:[#allocation5 + $0x48] sm:$0xff]  ;;  %v83_v15 = vunpack.c.l.b16 %v45_v14  ;;  %v84_v16 = vunpack.c.h.b16 %v45_v14  ;;  %v294_v17 = vld [vmem:[#allocation5] sm:$0xff]  ;;  %v315_v21 = vld [vmem:[%s433_s2] ss:$0 sm:$0xff] }
  0x11   :  { %199 = vmatpush.bf16.msra.mxu1 %v308_v3  ;;  %v302_v18 = vld [vmem:[#allocation5 + $0x40] sm:$0xff] }
  0x12   :  { %v85_v19 = vpack.c.b16 %v83_v15, %v83_v15  ;;  %v86_v20 = vpack.c.b16 %v84_v16, %v84_v16 }
  0x14   :  { %187 = vmatpush.bf16.msra.mxu0 %v299_v4 }
  0x15   :  { %200 = vmatpush.bf16.msra.mxu1 %v307_v5 }
  0x18   :  { %188 = vmatpush.bf16.msra.mxu0 %v298_v6 }
  0x19   :  { %201 = vmatpush.bf16.msra.mxu1 %v306_v7 }
  0x1c   :  { %189 = vmatpush.bf16.msra.mxu0 %v297_v8 }
  0x1d   :  { %202 = vmatpush.bf16.msra.mxu1 %v305_v9 }
  0x20   :  { %190 = vmatpush.bf16.msra.mxu0 %v296_v10 }
  0x21   :  { %203 = vmatpush.bf16.msra.mxu1 %v304_v11 }
  0x24   :  { %191 = vmatpush.bf16.msra.mxu0 %v295_v12 }
  0x25   :  { %204 = vmatpush.bf16.msra.mxu1 %v303_v13 }
  0x28   :  { %192 = vmatpush.bf16.msra.mxu0 %v294_v17 }
  0x29   :  { %205 = vmatpush.bf16.msra.mxu1 %v302_v18 }
  0x2b   :  { %193 = vmatmul.bf16.vlgmr.msra.gmra.mxu0 %v85_v19 }
  0x2c   :  { %206 = vmatmul.bf16.vlgmr.msra.gmra.mxu1 %v86_v20 }
  0xa8   :  { %v194_v22 = vpop.f32.mrf.mxu0 }
  0xa9   :  { %v207_v23 = vpop.f32.mrf.mxu1  ;;  %v195_v24 = vadd.f32 %v315_v21, %v194_v22 }
  0xab   :  { %v208_v25 = vadd.f32 %v207_v23, %v195_v24 }
  0xad   :  { %211 = vst [vmem:[#allocation7] sm:$0xff] %v208_v25 }
  0xae   :  { %222 = dma.vmem_to_hbm [thread:$0]  %s218_s25, 128, %s220_s28, [#allocation4]  }
  0xb0   :  { %v196_v26 = vpop.f32.mrf.mxu0 }
  0xb1   :  { %v209_v27 = vpop.f32.mrf.mxu1 }
  0xb2   :  { %392 = dma.done.wait [#allocation4], 128  }
  0xb3   :  { %393 = vsyncadd [#allocation4], 4294967168 }
  0xb4   :  { %227 = vsyncpa [#allocation3], 1 }
  0xb5   :  { %228 = vsyncpa [#allocation6], 1 }
  0xb6   :  { %229 = vsyncpa [#allocation4], 1 }

</bundles_post_ra>
